<compile_context>
chip_gen: v7x
topology: tpu7x:2x2x1
jax: 0.10.0
libtpu: 0.0.40
codegen_flags: <defaults>
</compile_context>

<pallas_src>
import functools

import jax
import jax.numpy as jnp
from jax.experimental import pallas as pl
from jax.experimental.pallas import tpu as pltpu


def _round_up(n, m):
    return (n + m - 1) // m * m


def _sublane(dtype):
    # min sublane packing for the second-to-last dim: f32 -> 8, bf16 -> 16, i8/fp8 -> 32
    return {4: 8, 2: 16, 1: 32}.get(jnp.dtype(dtype).itemsize, 8)


def _vmem_cap_bytes():
    # Generation-aware VMEM ceiling: ~85% of physical capacity so Mosaic keeps
    # internal-scratch headroom (~54 MiB on v7x, ~109 MiB on v5e/v6e).
    try:
        cap = int(pltpu.get_tpu_info().vmem_capacity_bytes)
    except Exception:  # non-TPU / interpret fallback
        cap = 64 * 2 ** 20
    return int(cap * 0.85)


def _resblock_kernel(x_ref, w1_ref, w2_ref, prm_ref, o_ref, *,
                     nonlinear, has_ds, d_true, d_pad):
    """One batch tile of ResidualBlock.

    x_ref   : (bb, din_p)                      input tile (compute dtype)
    w1_ref  : (din_p, dout_p) or (din_p, 2*dout_p) fused [w1 | wd]
    w2_ref  : (dout_p, dout_p)
    prm_ref : (6 or 9, dout_p) f32 packed rows [b1,g1,be1,b2,g2,be2,(bd,gd,bed)]
    """
    x = x_ref[...]
    prm = prm_ref[...].astype(jnp.float32)

    b1, g1, be1 = prm[0:1], prm[1:2], prm[2:3]
    b2, g2, be2 = prm[3:4], prm[4:5], prm[5:6]

    inv_d = jnp.float32(1.0 / d_true)

    def layernorm(h, g, be, eps=1e-5):
        # Single pass: sum + sum-of-squares (2 XLU reductions per LN). Padded
        # lanes contribute 0 to both sums; divisor is the true feature count.
        # TODO(synk): for small dout (128-256) on v6e the kernel is XLU-bound;
        # the row sums could be moved onto the idle MXU (dot against a ones col).
        mu = jnp.sum(h, axis=-1, keepdims=True) * inv_d
        msq = jnp.sum(h * h, axis=-1, keepdims=True) * inv_d
        var = jnp.maximum(msq - mu * mu, 0.0)   # guard f32 cancellation
        return (h - mu) * jax.lax.rsqrt(var + eps) * g + be

    # Fused fc1 (+ downsample): one wide MXU push sharing x as the LHS.
    y = jnp.dot(x, w1_ref[...], preferred_element_type=jnp.float32)

    if has_ds:
        h = y[:, :d_pad] + b1
        bd, gd, bed = prm[6:7], prm[7:8], prm[8:9]
        idn = layernorm(y[:, d_pad:] + bd, gd, bed)
    else:
        h = y + b1
        idn = x.astype(jnp.float32)

    h = layernorm(h, g1, be1)
    if nonlinear:
        h = jnp.maximum(h, 0.0)

    h = jnp.dot(h.astype(w2_ref.dtype), w2_ref[...],
                preferred_element_type=jnp.float32) + b2
    h = layernorm(h, g2, be2)

    out = h + idn
    if nonlinear:
        out = jnp.maximum(out, 0.0)
    o_ref[...] = out.astype(o_ref.dtype)


def prepare_params(params, *, compute_dtype=jnp.bfloat16):
    """One-time weight packing: pad to 128 lanes, fuse [w1 | wd], pack the
    bias/gamma/beta slab (f32), cast MXU operands to compute_dtype.  Call once
    and reuse so the forward hot path does no HBM weight rewriting."""
    Din, Dout = params["w1"].shape
    has_ds = "wd" in params
    din_p = _round_up(Din, 128)
    dout_p = _round_up(Dout, 128)

    def pad2(a, r, c):
        return jnp.pad(a, ((0, r - a.shape[0]), (0, c - a.shape[1])))

    w1 = pad2(params["w1"], din_p, dout_p).astype(compute_dtype)
    if has_ds:
        wd = pad2(params["wd"], din_p, dout_p).astype(compute_dtype)
        w1cat = jnp.concatenate([w1, wd], axis=1)          # (din_p, 2*dout_p)
    else:
        w1cat = w1
    w2 = pad2(params["w2"], dout_p, dout_p).astype(compute_dtype)

    rows = [params["b1"], params["g1"], params["be1"],
            params["b2"], params["g2"], params["be2"]]
    if has_ds:
        rows += [params["bd"], params["gd"], params["bed"]]
    prm = jnp.concatenate(
        [pad2(r.astype(jnp.float32), 1, dout_p) for r in rows], axis=0)

    return dict(w1cat=w1cat, w2=w2, prm=prm, din=Din, dout=Dout,
                din_p=din_p, dout_p=dout_p, has_ds=has_ds,
                compute_dtype=jnp.dtype(compute_dtype))


def residual_block(x, packed, *, nonlinear, block_b=256):
    """x: (batch, input_dim); packed: output of prepare_params()."""
    B, Din = x.shape
    assert Din == packed["din"], "input feature dim mismatch with prepared params"
    Dout = packed["dout"]
    din_p, dout_p = packed["din_p"], packed["dout_p"]
    has_ds = packed["has_ds"]
    cdt = packed["compute_dtype"]
    out_dtype = x.dtype

    w1cat, w2, prm = packed["w1cat"], packed["w2"], packed["prm"]
    w1cat_w = w1cat.shape[1]
    n_rows = prm.shape[0]

    # --- batch tiling: balance tiles (minimize zero-padding waste), align to
    # the compute dtype's sublane packing, and keep >=2 grid steps when
    # possible so the "parallel" batch axis shards across v7x's two cores.
    sub = _sublane(cdt)
    n_tiles = max(1, pl.cdiv(B, block_b))
    bb = _round_up(pl.cdiv(B, n_tiles), sub)
    if pl.cdiv(B, bb) < 2 and bb > sub:
        bb = _round_up(pl.cdiv(bb, 2), sub)
    b_p = _round_up(max(B, bb), bb)
    grid = (b_p // bb,)

    xp = jnp.pad(x, ((0, b_p - B), (0, din_p - Din))).astype(cdt)

    # --- VMEM budget: weights/params single-buffered, x/out double-buffered.
    vmem_cap = _vmem_cap_bytes()
    weight_bytes = w1cat.nbytes + w2.nbytes + prm.nbytes
    if weight_bytes > vmem_cap // 3:
        # TODO(synk): add a K-dimension grid axis (tile din_p with an f32 VMEM
        # accumulator + pl.when init/finalize) for the fused first matmul so
        # very large layers fit on v7x (64 MiB VMEM) instead of staying
        # fully weight-resident.
        raise NotImplementedError(
            f"resident weights ({weight_bytes} B) exceed 1/3 of the VMEM cap "
            f"({vmem_cap} B); K-tiling not implemented")

    in_sz = jnp.dtype(cdt).itemsize
    out_sz = jnp.dtype(out_dtype).itemsize
    vmem_est = (2 * bb * din_p * in_sz              # double-buffered x tiles
                + 2 * bb * dout_p * out_sz          # double-buffered out tiles
                + weight_bytes                      # single-buffered weights/slab
                + 4 * bb * (w1cat_w + 2 * dout_p) * 4)  # f32 intermediates headroom
    vmem_limit = int(min(max(2 * vmem_est, 32 * 2 ** 20), vmem_cap))

    cost = pl.CostEstimate(
        flops=int(2 * b_p * din_p * w1cat_w + 2 * b_p * dout_p * dout_p),
        transcendentals=int((3 if has_ds else 2) * b_p),
        bytes_accessed=int(xp.nbytes + b_p * dout_p * out_sz + weight_bytes),
    )

    kernel = functools.partial(_resblock_kernel, nonlinear=nonlinear,
                               has_ds=has_ds, d_true=Dout, d_pad=dout_p)

    out_p = pl.pallas_call(
        kernel,
        out_shape=jax.ShapeDtypeStruct((b_p, dout_p), out_dtype),
        grid_spec=pltpu.PrefetchScalarGridSpec(
            num_scalar_prefetch=0,
            grid=grid,
            in_specs=[
                pl.BlockSpec((bb, din_p), lambda i: (i, 0)),
                # Grid-invariant operands: fetched once, single-buffered.
                pl.BlockSpec((din_p, w1cat_w), lambda i: (0, 0),
                             pipeline_mode=pl.Buffered(1)),
                pl.BlockSpec((dout_p, dout_p), lambda i: (0, 0),
                             pipeline_mode=pl.Buffered(1)),
                pl.BlockSpec((n_rows, dout_p), lambda i: (0, 0),
                             pipeline_mode=pl.Buffered(1)),
            ],
            out_specs=pl.BlockSpec((bb, dout_p), lambda i: (i, 0)),
        ),
        compiler_params=pltpu.CompilerParams(
            dimension_semantics=("parallel",),
            vmem_limit_bytes=vmem_limit),
        cost_estimate=cost,
    )(xp, w1cat, w2, prm)

    return out_p[:B, :Dout]


# ----------------------------- reference & test ------------------------------

def _layernorm_ref(h, gamma, beta, eps=1e-5):
    mu = jnp.mean(h, axis=-1, keepdims=True)
    var = jnp.mean((h - mu) * (h - mu), axis=-1, keepdims=True)
    return (h - mu) * jax.lax.rsqrt(var + eps) * gamma + beta


def residual_block_ref(x, params, *, nonlinear):
    """Plain-JAX reference mirroring the PyTorch forward."""
    h = _layernorm_ref(x @ params["w1"] + params["b1"], params["g1"], params["be1"])
    if nonlinear:
        h = jnp.maximum(h, 0.0)
    h = _layernorm_ref(h @ params["w2"] + params["b2"], params["g2"], params["be2"])
    if "wd" in params:
        idn = _layernorm_ref(x @ params["wd"] + params["bd"],
                             params["gd"], params["bed"])
    else:
        idn = x
    out = h + idn
    if nonlinear:
        out = jnp.maximum(out, 0.0)
    return out


def make_params(key, input_dim, output_dim):
    """Deterministic synthetic parameters (shapes match the PyTorch module;
    Linear weights stored transposed, i.e. (in_features, out_features))."""
    ks = jax.random.split(key, 6)
    p = {
        "w1": jax.random.normal(ks[0], (input_dim, output_dim), jnp.float32) * 0.1,
        "b1": jax.random.normal(ks[1], (1, output_dim), jnp.float32) * 0.1,
        "g1": jnp.ones((1, output_dim), jnp.float32),
        "be1": jnp.zeros((1, output_dim), jnp.float32),
        "w2": jax.random.normal(ks[2], (output_dim, output_dim), jnp.float32) * 0.1,
        "b2": jax.random.normal(ks[3], (1, output_dim), jnp.float32) * 0.1,
        "g2": jnp.ones((1, output_dim), jnp.float32),
        "be2": jnp.zeros((1, output_dim), jnp.float32),
    }
    if input_dim != output_dim:
        p["wd"] = jax.random.normal(ks[4], (input_dim, output_dim), jnp.float32) * 0.1
        p["bd"] = jax.random.normal(ks[5], (1, output_dim), jnp.float32) * 0.1
        p["gd"] = jnp.ones((1, output_dim), jnp.float32)
        p["bed"] = jnp.zeros((1, output_dim), jnp.float32)
    return p


if __name__ == "__main__":
    key = jax.random.PRNGKey(0)
    k_x, k_p, k_x2, k_p2 = jax.random.split(key, 4)

    # --- Downsample path (input_dim != output_dim), nonlinear=True (both ReLUs).
    batch, input_dim, output_dim = 16, 16, 32
    x = jax.random.normal(k_x, (batch, input_dim), jnp.float32)
    params = make_params(k_p, input_dim, output_dim)
    ref = residual_block_ref(x, params, nonlinear=True)

    # f32 MXU operands -> tight check against the f32 reference.
    packed_f32 = prepare_params(params, compute_dtype=jnp.float32)
    out_f32 = jax.block_until_ready(residual_block(x, packed_f32, nonlinear=True))
    assert out_f32.shape == (batch, output_dim)
    assert jnp.allclose(out_f32, ref, atol=1e-4, rtol=1e-4), "mismatch (f32, downsample)"

    # Default bf16 MXU operands (f32 accumulate / f32 LN) -> looser tolerance.
    packed_bf16 = prepare_params(params)
    out_bf16 = jax.block_until_ready(residual_block(x, packed_bf16, nonlinear=True))
    assert out_bf16.shape == (batch, output_dim)
    assert jnp.allclose(out_bf16, ref, atol=5e-2, rtol=5e-2), "mismatch (bf16, downsample)"

    # --- Identity path (input_dim == output_dim), nonlinear=False.
    x2 = jax.random.normal(k_x2, (batch, output_dim), jnp.float32)
    params2 = make_params(k_p2, output_dim, output_dim)
    ref2 = residual_block_ref(x2, params2, nonlinear=False)
    packed2 = prepare_params(params2)
    out2 = jax.block_until_ready(residual_block(x2, packed2, nonlinear=False))
    assert jnp.allclose(out2, ref2, atol=5e-2, rtol=5e-2), "mismatch (bf16, identity)"

    print("KERNEL_OK")
</pallas_src>

<mosaic_0001>
module attributes {stable_mosaic.version = 11 : i64} {
  func.func @_resblock_kernel(%arg0: i32, %arg1: memref<8x128xf32, #tpu.memory_space<vmem>>, %arg2: memref<128x256xf32, #tpu.memory_space<vmem>>, %arg3: memref<128x128xf32, #tpu.memory_space<vmem>>, %arg4: memref<9x128xf32, #tpu.memory_space<vmem>>, %arg5: memref<8x128xf32, #tpu.memory_space<vmem>>) attributes {dimension_semantics = [#tpu.dimension_semantics<parallel>], iteration_bounds = array<i64: 2>, scalar_prefetch = 0 : i64, scratch_operands = 0 : i64, tpu.core_type = #tpu.core_type<tc>, window_params = [{transform_indices = @transform_0, window_bounds = array<i64: 8, 128>}, {pipeline_mode = #tpu.pipeline_mode<synchronous>, transform_indices = @transform_1, window_bounds = array<i64: 128, 256>}, {pipeline_mode = #tpu.pipeline_mode<synchronous>, transform_indices = @transform_2, window_bounds = array<i64: 128, 128>}, {pipeline_mode = #tpu.pipeline_mode<synchronous>, transform_indices = @transform_3, window_bounds = array<i64: 9, 128>}, {transform_indices = @transform_4, window_bounds = array<i64: 8, 128>}]} {
    %c0 = arith.constant 0 : index
    %c0_0 = arith.constant 0 : index
    %0 = vector.load %arg1[%c0, %c0_0] : memref<8x128xf32, #tpu.memory_space<vmem>>, vector<8x128xf32>
    %c0_1 = arith.constant 0 : index
    %c0_2 = arith.constant 0 : index
    %1 = vector.load %arg4[%c0_1, %c0_2] : memref<9x128xf32, #tpu.memory_space<vmem>>, vector<9x128xf32>
    %2 = vector.extract_strided_slice %1 {offsets = [0, 0], sizes = [1, 128], strides = [1, 1]} : vector<9x128xf32> to vector<1x128xf32>
    %3 = vector.extract_strided_slice %1 {offsets = [1, 0], sizes = [1, 128], strides = [1, 1]} : vector<9x128xf32> to vector<1x128xf32>
    %4 = vector.extract_strided_slice %1 {offsets = [2, 0], sizes = [1, 128], strides = [1, 1]} : vector<9x128xf32> to vector<1x128xf32>
    %5 = vector.extract_strided_slice %1 {offsets = [3, 0], sizes = [1, 128], strides = [1, 1]} : vector<9x128xf32> to vector<1x128xf32>
    %6 = vector.extract_strided_slice %1 {offsets = [4, 0], sizes = [1, 128], strides = [1, 1]} : vector<9x128xf32> to vector<1x128xf32>
    %7 = vector.extract_strided_slice %1 {offsets = [5, 0], sizes = [1, 128], strides = [1, 1]} : vector<9x128xf32> to vector<1x128xf32>
    %c0_3 = arith.constant 0 : index
    %c0_4 = arith.constant 0 : index
    %8 = vector.load %arg2[%c0_3, %c0_4] : memref<128x256xf32, #tpu.memory_space<vmem>>, vector<128x256xf32>
    %cst = arith.constant dense<0.000000e+00> : vector<8x256xf32>
    %9 = tpu.matmul %0, %8, %cst {dimension_numbers = #tpu.dot_dimension_numbers<[1], [0], [0], [1], [0, 0, 1, 1], [], []>} : vector<8x128xf32>, vector<128x256xf32>, vector<8x256xf32> -> vector<8x256xf32>
    %10 = vector.extract_strided_slice %9 {offsets = [0, 0], sizes = [8, 128], strides = [1, 1]} : vector<8x256xf32> to vector<8x128xf32>
    %11 = vector.broadcast %2 : vector<1x128xf32> to vector<8x128xf32>
    %12 = arith.addf %10, %11 : vector<8x128xf32>
    %13 = vector.extract_strided_slice %1 {offsets = [6, 0], sizes = [1, 128], strides = [1, 1]} : vector<9x128xf32> to vector<1x128xf32>
    %14 = vector.extract_strided_slice %1 {offsets = [7, 0], sizes = [1, 128], strides = [1, 1]} : vector<9x128xf32> to vector<1x128xf32>
    %15 = vector.extract_strided_slice %1 {offsets = [8, 0], sizes = [1, 128], strides = [1, 1]} : vector<9x128xf32> to vector<1x128xf32>
    %16 = vector.extract_strided_slice %9 {offsets = [0, 128], sizes = [8, 128], strides = [1, 1]} : vector<8x256xf32> to vector<8x128xf32>
    %17 = vector.broadcast %13 : vector<1x128xf32> to vector<8x128xf32>
    %18 = arith.addf %16, %17 : vector<8x128xf32>
    %cst_5 = arith.constant dense<0.000000e+00> : vector<8xf32>
    %19 = vector.multi_reduction <add>, %18, %cst_5 [1] : vector<8x128xf32> to vector<8xf32>
    %20 = vector.shape_cast %19 : vector<8xf32> to vector<8x1xf32>
    %cst_6 = arith.constant 3.125000e-02 : f32
    %21 = vector.broadcast %cst_6 : f32 to vector<8x1xf32>
    %22 = arith.mulf %20, %21 : vector<8x1xf32>
    %23 = arith.mulf %18, %18 : vector<8x128xf32>
    %cst_7 = arith.constant dense<0.000000e+00> : vector<8xf32>
    %24 = vector.multi_reduction <add>, %23, %cst_7 [1] : vector<8x128xf32> to vector<8xf32>
    %25 = vector.shape_cast %24 : vector<8xf32> to vector<8x1xf32>
    %cst_8 = arith.constant 3.125000e-02 : f32
    %26 = vector.broadcast %cst_8 : f32 to vector<8x1xf32>
    %27 = arith.mulf %25, %26 : vector<8x1xf32>
    %28 = arith.mulf %22, %22 : vector<8x1xf32>
    %29 = arith.subf %27, %28 : vector<8x1xf32>
    %cst_9 = arith.constant 0.000000e+00 : f32
    %30 = vector.broadcast %cst_9 : f32 to vector<8x1xf32>
    %31 = arith.maximumf %29, %30 : vector<8x1xf32>
    %32 = vector.broadcast %22 : vector<8x1xf32> to vector<8x128xf32>
    %33 = arith.subf %18, %32 : vector<8x128xf32>
    %cst_10 = arith.constant 9.99999974E-6 : f32
    %34 = vector.broadcast %cst_10 : f32 to vector<8x1xf32>
    %35 = arith.addf %31, %34 : vector<8x1xf32>
    %36 = math.rsqrt %35 : vector<8x1xf32>
    %37 = vector.broadcast %36 : vector<8x1xf32> to vector<8x128xf32>
    %38 = arith.mulf %33, %37 : vector<8x128xf32>
    %39 = vector.broadcast %14 : vector<1x128xf32> to vector<8x128xf32>
    %40 = arith.mulf %38, %39 : vector<8x128xf32>
    %41 = vector.broadcast %15 : vector<1x128xf32> to vector<8x128xf32>
    %42 = arith.addf %40, %41 : vector<8x128xf32>
    %cst_11 = arith.constant dense<0.000000e+00> : vector<8xf32>
    %43 = vector.multi_reduction <add>, %12, %cst_11 [1] : vector<8x128xf32> to vector<8xf32>
    %44 = vector.shape_cast %43 : vector<8xf32> to vector<8x1xf32>
    %cst_12 = arith.constant 3.125000e-02 : f32
    %45 = vector.broadcast %cst_12 : f32 to vector<8x1xf32>
    %46 = arith.mulf %44, %45 : vector<8x1xf32>
    %47 = arith.mulf %12, %12 : vector<8x128xf32>
    %cst_13 = arith.constant dense<0.000000e+00> : vector<8xf32>
    %48 = vector.multi_reduction <add>, %47, %cst_13 [1] : vector<8x128xf32> to vector<8xf32>
    %49 = vector.shape_cast %48 : vector<8xf32> to vector<8x1xf32>
    %cst_14 = arith.constant 3.125000e-02 : f32
    %50 = vector.broadcast %cst_14 : f32 to vector<8x1xf32>
    %51 = arith.mulf %49, %50 : vector<8x1xf32>
    %52 = arith.mulf %46, %46 : vector<8x1xf32>
    %53 = arith.subf %51, %52 : vector<8x1xf32>
    %cst_15 = arith.constant 0.000000e+00 : f32
    %54 = vector.broadcast %cst_15 : f32 to vector<8x1xf32>
    %55 = arith.maximumf %53, %54 : vector<8x1xf32>
    %56 = vector.broadcast %46 : vector<8x1xf32> to vector<8x128xf32>
    %57 = arith.subf %12, %56 : vector<8x128xf32>
    %cst_16 = arith.constant 9.99999974E-6 : f32
    %58 = vector.broadcast %cst_16 : f32 to vector<8x1xf32>
    %59 = arith.addf %55, %58 : vector<8x1xf32>
    %60 = math.rsqrt %59 : vector<8x1xf32>
    %61 = vector.broadcast %60 : vector<8x1xf32> to vector<8x128xf32>
    %62 = arith.mulf %57, %61 : vector<8x128xf32>
    %63 = vector.broadcast %3 : vector<1x128xf32> to vector<8x128xf32>
    %64 = arith.mulf %62, %63 : vector<8x128xf32>
    %65 = vector.broadcast %4 : vector<1x128xf32> to vector<8x128xf32>
    %66 = arith.addf %64, %65 : vector<8x128xf32>
    %cst_17 = arith.constant 0.000000e+00 : f32
    %67 = vector.broadcast %cst_17 : f32 to vector<8x128xf32>
    %68 = arith.maximumf %66, %67 : vector<8x128xf32>
    %c0_18 = arith.constant 0 : index
    %c0_19 = arith.constant 0 : index
    %69 = vector.load %arg3[%c0_18, %c0_19] : memref<128x128xf32, #tpu.memory_space<vmem>>, vector<128x128xf32>
    %cst_20 = arith.constant dense<0.000000e+00> : vector<8x128xf32>
    %70 = tpu.matmul %68, %69, %cst_20 {dimension_numbers = #tpu.dot_dimension_numbers<[1], [0], [0], [1], [0, 0, 1, 1], [], []>} : vector<8x128xf32>, vector<128x128xf32>, vector<8x128xf32> -> vector<8x128xf32>
    %71 = vector.broadcast %5 : vector<1x128xf32> to vector<8x128xf32>
    %72 = arith.addf %70, %71 : vector<8x128xf32>
    %cst_21 = arith.constant dense<0.000000e+00> : vector<8xf32>
    %73 = vector.multi_reduction <add>, %72, %cst_21 [1] : vector<8x128xf32> to vector<8xf32>
    %74 = vector.shape_cast %73 : vector<8xf32> to vector<8x1xf32>
    %cst_22 = arith.constant 3.125000e-02 : f32
    %75 = vector.broadcast %cst_22 : f32 to vector<8x1xf32>
    %76 = arith.mulf %74, %75 : vector<8x1xf32>
    %77 = arith.mulf %72, %72 : vector<8x128xf32>
    %cst_23 = arith.constant dense<0.000000e+00> : vector<8xf32>
    %78 = vector.multi_reduction <add>, %77, %cst_23 [1] : vector<8x128xf32> to vector<8xf32>
    %79 = vector.shape_cast %78 : vector<8xf32> to vector<8x1xf32>
    %cst_24 = arith.constant 3.125000e-02 : f32
    %80 = vector.broadcast %cst_24 : f32 to vector<8x1xf32>
    %81 = arith.mulf %79, %80 : vector<8x1xf32>
    %82 = arith.mulf %76, %76 : vector<8x1xf32>
    %83 = arith.subf %81, %82 : vector<8x1xf32>
    %cst_25 = arith.constant 0.000000e+00 : f32
    %84 = vector.broadcast %cst_25 : f32 to vector<8x1xf32>
    %85 = arith.maximumf %83, %84 : vector<8x1xf32>
    %86 = vector.broadcast %76 : vector<8x1xf32> to vector<8x128xf32>
    %87 = arith.subf %72, %86 : vector<8x128xf32>
    %cst_26 = arith.constant 9.99999974E-6 : f32
    %88 = vector.broadcast %cst_26 : f32 to vector<8x1xf32>
    %89 = arith.addf %85, %88 : vector<8x1xf32>
    %90 = math.rsqrt %89 : vector<8x1xf32>
    %91 = vector.broadcast %90 : vector<8x1xf32> to vector<8x128xf32>
    %92 = arith.mulf %87, %91 : vector<8x128xf32>
    %93 = vector.broadcast %6 : vector<1x128xf32> to vector<8x128xf32>
    %94 = arith.mulf %92, %93 : vector<8x128xf32>
    %95 = vector.broadcast %7 : vector<1x128xf32> to vector<8x128xf32>
    %96 = arith.addf %94, %95 : vector<8x128xf32>
    %97 = arith.addf %96, %42 : vector<8x128xf32>
    %cst_27 = arith.constant 0.000000e+00 : f32
    %98 = vector.broadcast %cst_27 : f32 to vector<8x128xf32>
    %99 = arith.maximumf %97, %98 : vector<8x128xf32>
    %c0_28 = arith.constant 0 : index
    %c0_29 = arith.constant 0 : index
    %100 = vector.load %arg5[%c0_28, %c0_29] : memref<8x128xf32, #tpu.memory_space<vmem>>, vector<8x128xf32>
    tpu.vector_store %arg5[%c0_28, %c0_29], %99 {strides = array<i32>} : memref<8x128xf32, #tpu.memory_space<vmem>>, vector<8x128xf32>,
    return
  }
  func.func @transform_0(%arg0: i32) -> (i32, i32) {
    %c0_i32 = arith.constant 0 : i32
    %c0_i32_0 = arith.constant 0 : i32
    return %arg0, %c0_i32 : i32, i32
  }
  func.func @transform_1(%arg0: i32) -> (i32, i32) {
    %c0_i32 = arith.constant 0 : i32
    %c0_i32_0 = arith.constant 0 : i32
    %c0_i32_1 = arith.constant 0 : i32
    return %c0_i32, %c0_i32_0 : i32, i32
  }
  func.func @transform_2(%arg0: i32) -> (i32, i32) {
    %c0_i32 = arith.constant 0 : i32
    %c0_i32_0 = arith.constant 0 : i32
    %c0_i32_1 = arith.constant 0 : i32
    return %c0_i32, %c0_i32_0 : i32, i32
  }
  func.func @transform_3(%arg0: i32) -> (i32, i32) {
    %c0_i32 = arith.constant 0 : i32
    %c0_i32_0 = arith.constant 0 : i32
    %c0_i32_1 = arith.constant 0 : i32
    return %c0_i32, %c0_i32_0 : i32, i32
  }
  func.func @transform_4(%arg0: i32) -> (i32, i32) {
    %c0_i32 = arith.constant 0 : i32
    %c0_i32_0 = arith.constant 0 : i32
    return %arg0, %c0_i32 : i32, i32
  }
}

</mosaic_0001>

<bundles_post_ra>
// kernel: tpu_custom_call.1
= control target key start
LH: loop header
LB: loop body
LE: loop exit
PB: predicated region body
PF: predicated region fallthrough
CT: control target
= control target key end

     0   :  { %9 = vsyncpa [#allocation3], 0  ;;  %s1388_s0 = inlined_call_operand.hbm [shape: f32[16,128], index: 0, kind: input, shape index: {}]   ;;  %s1389_s1 = inlined_call_operand.hbm [shape: f32[128,256], index: 1, kind: input, shape index: {}]   ;;  %s1390_s2 = inlined_call_operand.hbm [shape: f32[128,128], index: 2, kind: input, shape index: {}]   ;;  %s1391_s3 = inlined_call_operand.hbm [shape: f32[9,128], index: 3, kind: input, shape index: {}]   ;;  %s1392_s4 = inlined_call_operand.hbm [shape: f32[16,128], index: 4, kind: output, shape index: {}]  }
   0x1   :  { %11 = vsyncpa [#allocation3 + $0x1], 0 }
   0x2   :  { %12 = vsyncpa [#allocation6], 0 }
   0x3   :  { %13 = vsyncpa [#allocation9], 0 }
   0x4   :  { %14 = vsyncpa [#allocation4], 0 }
   0x5   :  { %16 = vsyncpa [#allocation4 + $0x1], 0  ;;  %s1096_s15 = smov 0   ;;  %s1098_s16 = smov 0  }
   0x6   :  { %s1100_s17 = smov 0   ;;  %s1102_s18 = smov 0  }
   0x7 LB: > { %s1117_s19 = sadd.s32 4294967295, %s1057_s18   ;;  %s652_s20 = sadd.s32 4294967294, %s1057_s18   ;;  %s1057_s18 = sphi %s1102_s18, %s1415_s18   ;;  %s1053_s17 = sphi %s1100_s17, %s1414_s17   ;;  %s1049_s16 = sphi %s1098_s16, %s1413_s16   ;;  %s1045_s15 = sphi %s1096_s15, %s1412_s15  }
   0x8   : > { %p42_p0 = scmp.ne.s32.totalorder %s1049_s16, %s1045_s15  ;;  %p1393_p1 = scmp.eq.s32.totalorder %s1117_s19, 0 }
   0x9   : > { %p135_p3 = scmp.eq.s32.totalorder %s652_s20, 1  ;;  %p653_p5 = scmp.ge.s32.totalorder %s1057_s18, 1 }
   0xa   : > { %p1126_p4 = por %p1393_p1, %p42_p0  ;;  %p142_p7 = scmp.lt.s32.totalorder %s1057_s18, 3 }
   0xb   : > { %p1131_p6 = por %p135_p3, %p42_p0  ;;  %s1059_s24 = smov [#allocation5]  }
   0xc   : > { %s1396_s21 = scalar_select %p1126_p4, 1, 0 }
   0xd   : > { %s1397_s22 = scalar_select %p1131_p6, 1, 0 }
   0xe   : > { %p1136_p8 = pnand %p653_p5, %p142_p7  ;;  %s154_s25 = sshll.u32 %s1059_s24, 4  ;;  %s1140_s25 = int_to_ptr.vmem [resolvable:$true] %s154_s25 }
   0xf   : > { %s1060_s27 = smov [#allocation7]   ;;  %s869_s5 = scalar_lea.hbm %s1389_s1, 4096 }
  0x10   : > { %s1398_s23 = scalar_select %p1136_p8, 1, 0 }
  0x11   : > { %p795_p9 = pneg %p1136_p8  ;;  %s167_s28 = sshll.u32 %s1060_s27, 4  ;;  %s1151_s28 = int_to_ptr.vmem [resolvable:$true] %s167_s28 }
  0x12   : > { %p870_p12 = scmp.ne.s32.totalorder %s1389_s1, %s869_s5  ;;  %p876_p5 = scmp.lt.u32.totalorder %s869_s5, %s1389_s1 }
  0x13   : > { %p1147_p11 = pnand %p795_p9, %p1393_p1 }
  0x15   : > { %p1161_p13 = pneg %p1147_p11 }
  0x17   : > { %p872_p0 = pnand %p1161_p13, %p870_p12 }
  0x19   : > { %p873_p3 = pneg %p872_p0 }
  0x1b   : > { %p878_p7 = pnand %p876_p5, %p873_p3 }
  0x1d   : > { %881 = shalt.err (!%p878_p7)
}
  0x1e   : > { %s882_s11 = scalar_lea.vmem %s1140_s25, 4096  ;;  %p890_p2 = scmp.lt.s32.totalorder %s1140_s25, %s1140_s25 }
  0x1f   : > { %p883_p9 = scmp.ne.s32.totalorder %s1140_s25, %s882_s11  ;;  %p891_p6 = scmp.lt.s32.totalorder %s882_s11, %s882_s11 }
  0x21   : > { %p885_p10 = pnand %p883_p9, %p1161_p13  ;;  %p892_p12 = por %p891_p6, %p890_p2 }
  0x23   : > { %p886_p1 = pneg %p885_p10 }
  0x25   : > { %p893_p0 = pnand %p892_p12, %p886_p1 }
  0x27   : > { %896 = shalt.err (!%p893_p0)
}
  0x28   : > { %s1061_s12 = smov 256   ;;  %s1062_s13 = smov 16  }
  0x29   : > { %798 = dma.hbm_to_vmem [thread:$0]  (!%p1147_p11), %s1389_s1, 4096, %s1140_s25, [#allocation6], %s1061_s12, %s1061_s12, %s1062_s13  }
  0x2a   : > { %s897_s29 = scalar_lea.hbm %s1390_s2, 2048 }
  0x2b   : > { %p898_p2 = scmp.ne.s32.totalorder %s1390_s2, %s897_s29  ;;  %p904_p10 = scmp.lt.u32.totalorder %s897_s29, %s1390_s2 }
  0x2d   : > { %p900_p1 = pnand %p898_p2, %p1161_p13 }
  0x2f   : > { %p901_p6 = pneg %p900_p1 }
  0x31   : > { %p906_p3 = pnand %p904_p10, %p901_p6 }
  0x33   : > { %909 = shalt.err (!%p906_p3)
}
  0x34   : > { %s910_s25 = scalar_lea.vmem %s1151_s28, 2048  ;;  %p918_p12 = scmp.lt.s32.totalorder %s1151_s28, %s1151_s28 }
  0x35   : > { %p911_p5 = scmp.ne.s32.totalorder %s1151_s28, %s910_s25  ;;  %p919_p0 = scmp.lt.s32.totalorder %s910_s25, %s910_s25 }
  0x37   : > { %p913_p7 = pnand %p911_p5, %p1161_p13  ;;  %p920_p2 = por %p919_p0, %p918_p12 }
  0x39   : > { %p914_p9 = pneg %p913_p7 }
  0x3b   : > { %p921_p1 = pnand %p920_p2, %p914_p9 }
  0x3d   : > { %924 = shalt.err (!%p921_p1)
}
  0x3e   : > { %s1063_s9 = smov 128   ;;  %s1064_s10 = smov 8  }
  0x3f   : > { %801 = dma.hbm_to_vmem [thread:$0]  (!%p1147_p11), %s1390_s2, 2048, %s1151_s28, [#allocation6], %s1063_s9, %s1063_s9, %s1064_s10  }
  0x40   : > { %s1065_s13 = smov [#allocation8]   ;;  %s1206_s20 = sadd.s32 1, %s1057_s18  }
  0x41   : > { %s180_s14 = sshll.u32 %s1065_s13, 4  ;;  %s925_s29 = scalar_lea.hbm %s1391_s3, 256  ;;  %s181_s14 = int_to_ptr.vmem [resolvable:$true] %s180_s14 }
  0x42   : > { %p926_p6 = scmp.ne.s32.totalorder %s1391_s3, %s925_s29  ;;  %p932_p5 = scmp.lt.u32.totalorder %s925_s29, %s1391_s3 }
  0x44   : > { %p928_p10 = pnand %p926_p6, %p1161_p13 }
  0x46   : > { %p929_p3 = pneg %p928_p10 }
  0x48   : > { %p934_p7 = pnand %p932_p5, %p929_p3 }
  0x4a   : > { %937 = shalt.err (!%p934_p7)
}
  0x4b   : > { %s938_s28 = scalar_lea.vmem %s181_s14, 256  ;;  %p946_p2 = scmp.lt.s32.totalorder %s181_s14, %s181_s14 }
  0x4c   : > { %p939_p9 = scmp.ne.s32.totalorder %s181_s14, %s938_s28  ;;  %p947_p1 = scmp.lt.s32.totalorder %s938_s28, %s938_s28 }
  0x4e   : > { %p941_p12 = pnand %p939_p9, %p1161_p13  ;;  %p948_p4 = por %p947_p1, %p946_p2 }
  0x50   : > { %p942_p0 = pneg %p941_p12 }
  0x52   : > { %p949_p8 = pnand %p948_p4, %p942_p0 }
  0x54   : > { %952 = shalt.err (!%p949_p8)
}
  0x55   : > { %804 = dma.hbm_to_vmem [thread:$0]  (!%p1147_p11), %s1391_s3, 256, %s181_s14, [#allocation9], %s1063_s9, %s1063_s9, %s1064_s10  }
  0x56   : > { %s26_s8 = ssub.s32 %s1057_s18, %s1206_s20  ;;  %s29_s12 = sadd.s32 1, %s1053_s17 }
  0x57   : > { %p27_p4 = scmp.eq.s32.totalorder %s26_s8, 0  ;;  %p36_p8 = scmp.ne.s32.totalorder %s1053_s17, %s1049_s16 }
  0x58   : > { %p37_p13 = scmp.eq.s32.totalorder %s1057_s18, 0  ;;  %p816_p6 = scmp.lt.s32.totalorder %s1057_s18, 2 }
  0x59   : > { %s1234_s26 = scalar_select %p27_p4, %s1053_s17, %s29_s12  }
  0x5a   : > { %p38_p10 = por %p37_p13, %p36_p8  ;;  %p1401_p3 = scmp.eq.s32.totalorder %s1117_s19, 1 }
  0x5b   : > { %s194_s24 = sand.u32 1, %s1053_s17   ;;  %s659_s27 = sshll.u32 %s1057_s18, 7 }
  0x5c   : > { %p1238_p5 = por %p1401_p3, %p36_p8  ;;  %s658_s29 = sshll.u32 %s194_s24, 3 }
  0x5d   : > { %s1247_s9 = scalar_lea.hbm %s1388_s0, %s659_s27  ;;  %s198_s10 = scalar_lea.vmem [#allocation2], %s658_s29 }
  0x5e   : > { %s205_s14 = sshll.u32 %s198_s10, 4  ;;  %p1249_p11 = pnand %p816_p6, %p38_p10  ;;  %s1253_s14 = int_to_ptr.vmem [resolvable:$true] %s205_s14 }
  0x5f   : > { %s195_s7 = scalar_lea.sflag [#allocation3], %s194_s24  ;;  %s953_s28 = scalar_lea.hbm %s1247_s9, 128 }
  0x60   : > { %p954_p7 = scmp.ne.s32.totalorder %s1247_s9, %s953_s28  ;;  %p955_p9 = pneg %p1249_p11 }
  0x61   : > { %s958_s8 = scalar_lea.hbm %s1388_s0, 256  ;;  %p959_p2 = scmp.lt.u32.totalorder %s1247_s9, %s1388_s0 }
  0x62   : > { %p956_p12 = pnand %p955_p9, %p954_p7  ;;  %p960_p1 = scmp.lt.u32.totalorder %s958_s8, %s953_s28 }
  0x63   : > { %p962_p8 = scmp.lt.u32.totalorder %s953_s28, %s1247_s9 }
  0x64   : > { %p957_p0 = pneg %p956_p12  ;;  %p961_p4 = por %p960_p1, %p959_p2 }
  0x66   : > { %p963_p13 = por %p962_p8, %p961_p4 }
  0x68   : > { %p964_p6 = pnand %p963_p13, %p957_p0 }
  0x6a   : > { %967 = shalt.err (!%p964_p6)
}
  0x6b   : > { %s968_s24 = scalar_lea.vmem %s1253_s14, 128  ;;  %s1066_s29 = smov [#allocation2]  }
  0x6c   : > { %p969_p10 = scmp.ne.s32.totalorder %s1253_s14, %s968_s24  ;;  %s973_s30 = sshll.u32 %s1066_s29, 4  ;;  %s974_s30 = int_to_ptr.vmem [resolvable:$false] %s973_s30 }
  0x6d   : > { %s975_s5 = scalar_lea.vmem %s974_s30, 256  ;;  %p976_p12 = scmp.lt.s32.totalorder %s1253_s14, %s974_s30 }
  0x6e   : > { %p971_p3 = pnand %p969_p10, %p955_p9  ;;  %p977_p2 = scmp.lt.s32.totalorder %s975_s5, %s968_s24 }
  0x70   : > { %p972_p7 = pneg %p971_p3  ;;  %p978_p1 = por %p977_p2, %p976_p12 }
  0x72   : > { %p979_p4 = pnand %p978_p1, %p972_p7 }
  0x74   : > { %982 = shalt.err (!%p979_p4)
}
  0x75   : > { %808 = dma.hbm_to_vmem [thread:$0]  (!%p1249_p11), %s1247_s9, 128, %s1253_s14, %s195_s7  }
  0x76   : > { %p1404_p0 = scmp.ne.s32.totalorder %s1398_s23, 0 }
  0x77   : > { %s1283_s10 = sand.u32 (!%p1404_p0), 1, %s1049_s16   ;;  %p1405_p9 = scmp.ne.s32.totalorder (!%p1404_p0), %s1396_s21, 0 }
  0x78   : > { %214 = sbr.rel (%p1404_p0) target bundleno = 960 (0x3c0), region = 36  ;;  %s661_s28 = sshll.u32 (!%p1404_p0), %s1283_s10, 3 }
  0x79   : > { %s217_s25 = scalar_lea.sflag (!%p1404_p0), [#allocation3], %s1283_s10  ;;  %s1289_s11 = scalar_lea.vmem (!%p1404_p0), [#allocation2], %s661_s28 }
  0x7f   : > { %1028 = dma.done.wait (%p1405_p9), %s217_s25, 128  }
  0x80   : > { %1030 = vsyncadd (%p1405_p9), %s217_s25, 4294967168  ;;  %p1406_p11 = scmp.eq.s32.totalorder %s1117_s19, 0 }
  0x82   : > { %1032 = dma.done.wait (%p1406_p11), [#allocation6], 6144   ;;  %p1407_p8 = pmov %p1406_p11 }
  0x84   : > { %1034 = vsyncadd (%p1407_p8), [#allocation6], 4294961152  ;;  %p1408_p13 = pmov %p1407_p8 }
  0x85   : > { %p1409_p6 = pmov %p1407_p8 }
  0x86   : > { %1036 = dma.done.wait (%p1408_p13), [#allocation9], 256  }
  0x87   : > { %1038 = vsyncadd (%p1409_p6), [#allocation9], 4294967040  ;;  %v1067_v0 = vmov 0.0   ;;  %v261_v1 = vld [vmem:[#allocation5 + $0x8] sm:$0xff]  ;;  %v263_v2 = vld [vmem:[#allocation5 + $0x18] sm:$0xff]  ;;  %v1068_v50 = vmov 0.0|0.0   ;;  %v363_v51 = vlaneseq }
  0x88   : > { %356 = vmatprep.mubr.f32.mxu0 %v1067_v0  ;;  %v260_v3 = vld [vmem:[#allocation5] sm:$0xff]  ;;  %v723_v4 = vpack.c.bf16 %v263_v2, %v261_v1  ;;  %v262_v5 = vld [vmem:[#allocation5 + $0x10] sm:$0xff]  ;;  %v265_v6 = vld [vmem:[#allocation5 + $0x28] sm:$0xff]  ;;  %755 = vmatprep.subr.bf16.mxu1 %v1068_v50  ;;  %vm1069_vm0 = vmmov 0   ;;  %s668_s21 = sshll.u32 %s1117_s19, 7  ;;  %s256_s23 = scalar_lea.vmem [#allocation10], %s661_s28 }
  0x89   : > { %v267_v7 = vld [vmem:[#allocation5 + $0x38] sm:$0xff]  ;;  %v725_v8 = vpack.c.bf16 %v262_v5, %v260_v3  ;;  %v264_v10 = vld [vmem:[#allocation5 + $0x20] sm:$0xff]  ;;  %v266_v11 = vld [vmem:[#allocation5 + $0x30] sm:$0xff]  ;;  %v1305_v52 = vshrl.u32 %v363_v51, 7  ;;  %720 = vmatprep.mubr.msk.f32.mxu1 %vm1069_vm0, %v1067_v0  ;;  %s553_s9 = sshll.u32 %s256_s23, 4  ;;  %s1344_s7 = scalar_lea.hbm %s1392_s4, %s668_s21  ;;  %s1346_s9 = int_to_ptr.vmem [resolvable:$true] %s553_s9 }
  0x8a   : > { %v727_v9 = vpack.c.bf16 %v267_v7, %v265_v6  ;;  %v269_v12 = vld [vmem:[#allocation5 + $0x48] sm:$0xff]  ;;  %724 = vmatprep.subr.bf16.mxu0 %v723_v4  ;;  %v271_v13 = vld [vmem:[#allocation5 + $0x58] sm:$0xff]  ;;  %v729_v14 = vpack.c.bf16 %v266_v11, %v264_v10  ;;  %v268_v16 = vld [vmem:[#allocation5 + $0x40] sm:$0xff]  ;;  %s540_s8 = scalar_lea.sflag [#allocation4], %s1283_s10  ;;  %s983_s12 = scalar_lea.vmem %s1346_s9, 128 }
  0x8b   : > { %726 = vmatpush1.bf16.msra.mxu0 %v725_v8  ;;  %v731_v15 = vpack.c.bf16 %v271_v13, %v269_v12  ;;  %v270_v17 = vld [vmem:[#allocation5 + $0x50] sm:$0xff]  ;;  %v273_v18 = vld [vmem:[#allocation5 + $0x68] sm:$0xff]  ;;  %v275_v19 = vld [vmem:[#allocation5 + $0x78] sm:$0xff]  ;;  %v365_v53 = vsub.s32 0, %v1305_v52  ;;  %v370_v55 = vsub.s32 6, %v1305_v52  ;;  %p984_p10 = scmp.ne.s32.totalorder %s1346_s9, %s983_s12  ;;  %s1070_s19 = smov [#allocation10]  }
  0x8c   : > { %728 = vmatprep.subr.bf16.mxu0 %v727_v9  ;;  %v733_v20 = vpack.c.bf16 %v270_v17, %v268_v16  ;;  %v735_v21 = vpack.c.bf16 %v275_v19, %v273_v18  ;;  %v272_v22 = vld [vmem:[#allocation5 + $0x60] sm:$0xff]  ;;  %v274_v23 = vld [vmem:[#allocation5 + $0x70] sm:$0xff]  ;;  %v277_v24 = vld [vmem:[#allocation5 + $0x88] sm:$0xff]  ;;  %s987_s27 = sshll.u32 %s1070_s19, 4  ;;  %s988_s27 = int_to_ptr.vmem [resolvable:$false] %s987_s27 }
  0x8d   : > { %v279_v25 = vld [vmem:[#allocation5 + $0x98] sm:$0xff]  ;;  %v737_v26 = vpack.c.bf16 %v274_v23, %v272_v22  ;;  %v276_v28 = vld [vmem:[#allocation5 + $0x80] sm:$0xff]  ;;  %v278_v29 = vld [vmem:[#allocation5 + $0x90] sm:$0xff]  ;;  %p985_p3 = pnand %p984_p10, %p1238_p5  ;;  %s989_s24 = scalar_lea.vmem %s988_s27, 256 }
  0x8e   : > { %v739_v27 = vpack.c.bf16 %v279_v25, %v277_v24  ;;  %v281_v30 = vld [vmem:[#allocation5 + $0xa8] sm:$0xff]  ;;  %v283_v31 = vld [vmem:[#allocation5 + $0xb8] sm:$0xff]  ;;  %v741_v32 = vpack.c.bf16 %v278_v29, %v276_v28  ;;  %v280_v34 = vld [vmem:[#allocation5 + $0xa0] sm:$0xff]  ;;  %p990_p12 = scmp.lt.s32.totalorder %s1346_s9, %s988_s27  ;;  %p991_p2 = scmp.lt.s32.totalorder %s989_s24, %s983_s12 }
  0x8f   : > { %730 = vmatpush1.bf16.msra.mxu0 %v729_v14  ;;  %v743_v33 = vpack.c.bf16 %v283_v31, %v281_v30  ;;  %v282_v35 = vld [vmem:[#allocation5 + $0xb0] sm:$0xff]  ;;  %v285_v36 = vld [vmem:[#allocation5 + $0xc8] sm:$0xff]  ;;  %v287_v37 = vld [vmem:[#allocation5 + $0xd8] sm:$0xff]  ;;  %p986_p7 = pneg %p985_p3 }
  0x90   : > { %732 = vmatprep.subr.bf16.mxu0 %v731_v15  ;;  %v745_v38 = vpack.c.bf16 %v282_v35, %v280_v34  ;;  %v747_v39 = vpack.c.bf16 %v287_v37, %v285_v36  ;;  %v284_v40 = vld [vmem:[#allocation5 + $0xc0] sm:$0xff]  ;;  %v286_v41 = vld [vmem:[#allocation5 + $0xd0] sm:$0xff]  ;;  %v289_v42 = vld [vmem:[#allocation5 + $0xe8] sm:$0xff]  ;;  %v418_v34 = vsub.s32 2, %v1305_v52  ;;  %p992_p1 = por %p991_p2, %p990_p12 }
  0x91   : > { %v291_v43 = vld [vmem:[#allocation5 + $0xf8] sm:$0xff]  ;;  %v749_v44 = vpack.c.bf16 %v286_v41, %v284_v40  ;;  %v288_v46 = vld [vmem:[#allocation5 + $0xe0] sm:$0xff]  ;;  %v290_v47 = vld [vmem:[#allocation5 + $0xf0] sm:$0xff] }
  0x92   : > { %v751_v45 = vpack.c.bf16 %v291_v43, %v289_v42  ;;  %v753_v48 = vpack.c.bf16 %v290_v47, %v288_v46  ;;  %v257_v49 = vld [vmem:[%s1289_s11] sm:$0xff]  ;;  %v1308_v54 = vld [vmem:[#allocation8] sm:$0xff]  ;;  %v423_v2 = vld [vmem:[#allocation7 + $0x8] sm:$0xff]  ;;  %v440_v42 = vsub.s32 3, %v1305_v52  ;;  %p993_p4 = pnand %p992_p1, %p986_p7 }
  0x93   : > { %734 = vmatpush1.bf16.msra.mxu0 %v733_v20  ;;  %v366_v56 = vrot.slane %v1308_v54, %v365_v53  ;;  %v371_v57 = vrot.slane %v1308_v54, %v370_v55  ;;  %v422_v1 = vld [vmem:[#allocation7] sm:$0xff]  ;;  %v424_v4 = vld [vmem:[#allocation7 + $0x10] sm:$0xff]  ;;  %v425_v5 = vld [vmem:[#allocation7 + $0x18] sm:$0xff]  ;;  %v419_v0 = vrot.slane %v1308_v54, %v418_v34 }
  0x94   : > { %736 = vmatprep.subr.bf16.mxu0 %v735_v21  ;;  %v756_v3 = vpack.c.bf16 %v423_v2, %v422_v1  ;;  %v759_v6 = vpack.c.bf16 %v425_v5, %v424_v4  ;;  %v426_v7 = vld [vmem:[#allocation7 + $0x20] sm:$0xff]  ;;  %v427_v8 = vld [vmem:[#allocation7 + $0x28] sm:$0xff]  ;;  %v428_v10 = vld [vmem:[#allocation7 + $0x30] sm:$0xff]  ;;  %v441_v43 = vrot.slane %v1308_v54, %v440_v42  ;;  %v389_v4 = vsub.s32 7, %v1305_v52 }
  0x95   : > { %v762_v9 = vpack.c.bf16 %v427_v8, %v426_v7  ;;  %v429_v11 = vld [vmem:[#allocation7 + $0x38] sm:$0xff]  ;;  %v430_v13 = vld [vmem:[#allocation7 + $0x40] sm:$0xff]  ;;  %v431_v14 = vld [vmem:[#allocation7 + $0x48] sm:$0xff]  ;;  %v528_v7 = vsub.s32 4, %v1305_v52 }
  0x96   : > { %757 = vmatpush3.bf16.msra.mxu1 %v756_v3  ;;  %v765_v12 = vpack.c.bf16 %v429_v11, %v428_v10  ;;  %v768_v15 = vpack.c.bf16 %v431_v14, %v430_v13  ;;  %v432_v16 = vld [vmem:[#allocation7 + $0x50] sm:$0xff]  ;;  %v433_v17 = vld [vmem:[#allocation7 + $0x58] sm:$0xff]  ;;  %v434_v19 = vld [vmem:[#allocation7 + $0x60] sm:$0xff]  ;;  %v533_v10 = vsub.s32 5, %v1305_v52 }
  0x97   : > { %738 = vmatpush1.bf16.msra.mxu0 %v737_v26  ;;  %758 = vmatprep.subr.bf16.mxu1 %v1068_v50  ;;  %v771_v18 = vpack.c.bf16 %v433_v17, %v432_v16  ;;  %v435_v20 = vld [vmem:[#allocation7 + $0x68] sm:$0xff]  ;;  %v436_v22 = vld [vmem:[#allocation7 + $0x70] sm:$0xff]  ;;  %v437_v23 = vld [vmem:[#allocation7 + $0x78] sm:$0xff] }
  0x98   : > { %740 = vmatprep.subr.bf16.mxu0 %v739_v27  ;;  %v774_v21 = vpack.c.bf16 %v435_v20, %v434_v19  ;;  %v777_v24 = vpack.c.bf16 %v437_v23, %v436_v22  ;;  %v534_v16 = vrot.slane %v1308_v54, %v533_v10  ;;  %v666_v17 = vld [vmem:[#allocation8 + $0x8] ss:$0 sm:$0xff] }
  0x9a   : > { %760 = vmatpush3.bf16.msra.mxu1 %v759_v6 }
  0x9b   : > { %742 = vmatpush1.bf16.msra.mxu0 %v741_v32  ;;  %761 = vmatprep.subr.bf16.mxu1 %v1068_v50 }
  0x9c   : > { %744 = vmatprep.subr.bf16.mxu0 %v743_v33  ;;  %v413_v33 = vsub.s32 1, %v1305_v52 }
  0x9e   : > { %763 = vmatpush3.bf16.msra.mxu1 %v762_v9  ;;  %v414_v36 = vrot.slane %v1308_v54, %v413_v33  ;;  %v390_v9 = vrot.slane %v1308_v54, %v389_v4 }
  0x9f   : > { %746 = vmatpush1.bf16.msra.mxu0 %v745_v38  ;;  %764 = vmatprep.subr.bf16.mxu1 %v1068_v50 }
  0xa0   : > { %748 = vmatprep.subr.bf16.mxu0 %v747_v39 }
  0xa2   : > { %766 = vmatpush3.bf16.msra.mxu1 %v765_v12  ;;  %v529_v12 = vrot.slane %v1308_v54, %v528_v7 }
  0xa3   : > { %750 = vmatpush1.bf16.msra.mxu0 %v749_v44  ;;  %767 = vmatprep.subr.bf16.mxu1 %v1068_v50 }
  0xa4   : > { %752 = vmatprep.subr.bf16.mxu0 %v751_v45 }
  0xa6   : > { %769 = vmatpush3.bf16.msra.mxu1 %v768_v15 }
  0xa7   : > { %754 = vmatpush1.bf16.msra.mxu0 %v753_v48  ;;  %770 = vmatprep.subr.bf16.mxu1 %v1068_v50 }
  0xaa   : > { %357 = vmatmul.mubr.f32.vlgmr.msra.gmra.mrb[0].mxu0 %v257_v49  ;;  %772 = vmatpush3.bf16.msra.mxu1 %v771_v18 }
  0xab   : > { %773 = vmatprep.subr.bf16.mxu1 %v1068_v50 }
  0xae   : > { %775 = vmatpush3.bf16.msra.mxu1 %v774_v21 }
  0xaf   : > { %776 = vmatprep.subr.bf16.mxu1 %v1068_v50 }
  0xb2   : > { %778 = vmatpush3.bf16.msra.mxu1 %v777_v24 }
 0x17d   : > { %v358_v58 = vpop.f32.mrb[0].mxu0 }
 0x17e   : > { %v1313_v59 = vadd.f32 %v366_v56, %v358_v58  ;;  %v360_v60 = vpop.f32.mrb[1].mxu0 }
 0x17f   : > { %v1315_v61 = vadd.f32 %v371_v57, %v360_v60 }
 0x180   : > { %397 = vadd.xlane.f32.xlu0 %v1313_v59  ;;  %v400_v62 = vmul.f32 %v1313_v59, %v1313_v59 }
 0x181   : > { %373 = vadd.xlane.f32.xlu1 %v1315_v61  ;;  %v376_v63 = vmul.f32 %v1315_v61, %v1315_v61 }
 0x184   : > { %401 = vadd.xlane.f32.xlu0 %v400_v62 }
 0x188   : > { %377 = vadd.xlane.f32.xlu0 %v376_v63 }
 0x20d   : > { %v398_v25 = vpop.xlane.xlu0 %397 }
 0x20e   : > { %v399_v26 = vmul.f32 0.03125, %v398_v25  ;;  %v374_v48 = vpop.xlane.xlu1 %373 }
 0x20f   : > { %v375_v50 = vmul.f32 0.03125, %v374_v48 }
 0x210   : > { %v404_v28 = vmul.f32 %v399_v26, %v399_v26  ;;  %v407_v35 = vsub.f32 %v1313_v59, %v399_v26 }
 0x211   : > { %v402_v27 = vpop.xlane.xlu0 %401  ;;  %v380_v53 = vmul.f32 %v375_v50, %v375_v50  ;;  %v383_v6 = vsub.f32 %v1315_v61, %v375_v50 }
 0x212   : > { %v403_v29 = vmul.f32 0.03125, %v402_v27 }
 0x214   : > { %v405_v30 = vsub.f32 %v403_v29, %v404_v28 }
 0x215   : > { %v378_v49 = vpop.xlane.xlu0 %377 }
 0x216   : > { %v406_v31 = vmax.f32 %v405_v30, 0.0  ;;  %v379_v51 = vmul.f32 0.03125, %v378_v49 }
 0x218   : > { %v408_v32 = vadd.f32 1e-05, %v406_v31  ;;  %v381_v55 = vsub.f32 %v379_v51, %v380_v53 }
 0x21a   : > { %863 = vrsqrt.f32 %v408_v32  ;;  %v382_v56 = vmax.f32 %v381_v55, 0.0 }
 0x21c   : > { %v384_v59 = vadd.f32 1e-05, %v382_v56 }
 0x21e   : > { %865 = vrsqrt.f32 %v384_v59 }
 0x224   : > { %v864_v37 = vpop.eup %863 }
 0x225   : > { %v410_v38 = vmul.f32 %v864_v37, %v407_v35 }
 0x227   : > { %v415_v39 = vmul.f32 %v414_v36, %v410_v38 }
 0x228   : > { %v866_v5 = vpop.eup %865 }
 0x229   : > { %v420_v40 = vadd.f32 %v419_v0, %v415_v39  ;;  %v386_v8 = vmul.f32 %v866_v5, %v383_v6 }
 0x22b   : > { %v421_v41 = vmax.f32 %v420_v40, 0.0  ;;  %v391_v15 = vmul.f32 %v390_v9, %v386_v8 }
 0x22d   : > { %721 = vmatmul.mubr.f32.vlgmr.msra.gmra.mrb[0].mxu1 %v421_v41  ;;  %v396_v18 = vadd.f32 %v666_v17, %v391_v15 }
 0x300   : > { %v508_v44 = vpop.f32.mrb[0].mxu1 }
 0x301   : > { %v509_v45 = vadd.f32 %v508_v44, %v441_v43  ;;  %v722_v46 = vpop.f32.mrb[1].mxu1 }
 0x303   : > { %512 = vadd.xlane.f32.xlu1 %v509_v45  ;;  %v515_v47 = vmul.f32 %v509_v45, %v509_v45 }
 0x307   : > { %516 = vadd.xlane.f32.xlu1 %v515_v47 }
 0x390   : > { %v513_v57 = vpop.xlane.xlu1 %512 }
 0x391   : > { %v514_v58 = vmul.f32 0.03125, %v513_v57 }
 0x393   : > { %v519_v62 = vmul.f32 %v514_v58, %v514_v58  ;;  %v522_v11 = vsub.f32 %v509_v45, %v514_v58 }
 0x394   : > { %v517_v60 = vpop.xlane.xlu1 %516 }
 0x395   : > { %v518_v63 = vmul.f32 0.03125, %v517_v60 }
 0x397   : > { %v520_v1 = vsub.f32 %v518_v63, %v519_v62 }
 0x399   : > { %v521_v2 = vmax.f32 %v520_v1, 0.0 }
 0x39b   : > { %v523_v3 = vadd.f32 1e-05, %v521_v2 }
 0x39d   : > { %867 = vrsqrt.f32 %v523_v3 }
 0x3a7   : > { %v868_v13 = vpop.eup %867 }
 0x3a8   : > { %v525_v14 = vmul.f32 %v868_v13, %v522_v11 }
 0x3aa   : > { %v530_v61 = vmul.f32 %v529_v12, %v525_v14 }
 0x3ac   : > { %v535_v19 = vadd.f32 %v534_v16, %v530_v61 }
 0x3ae   : > { %v536_v20 = vadd.f32 %v535_v19, %v396_v18 }
 0x3b0   : > { %v537_v52 = vmax.f32 %v536_v20, 0.0 }
 0x3b2   : > { %538 = vst [vmem:[%s256_s23] sm:$0xff] %v537_v52 }
 0x3b3   : > { %996 = shalt.err (!%p993_p4)
}
 0x3b4   : > { %s997_s29 = scalar_lea.hbm %s1344_s7, 128  ;;  %s1001_s10 = scalar_lea.hbm %s1392_s4, 256 }
 0x3b5   : > { %p998_p0 = scmp.ne.s32.totalorder %s1344_s7, %s997_s29  ;;  %p1002_p8 = scmp.lt.u32.totalorder %s1344_s7, %s1392_s4 }
 0x3b6   : > { %p1003_p13 = scmp.lt.u32.totalorder %s1001_s10, %s997_s29  ;;  %p1005_p10 = scmp.lt.u32.totalorder %s997_s29, %s1344_s7 }
 0x3b7   : > { %p999_p9 = pnand %p998_p0, %p1238_p5 }
 0x3b8   : > { %p1004_p6 = por %p1003_p13, %p1002_p8 }
 0x3b9   : > { %p1000_p11 = pneg %p999_p9 }
 0x3ba   : > { %p1006_p3 = por %p1005_p10, %p1004_p6 }
 0x3bc   : > { %p1007_p7 = pnand %p1006_p3, %p1000_p11 }
 0x3be   : > { %1010 = shalt.err (!%p1007_p7)
}
 0x3bf   : > { %793 = dma.vmem_to_hbm [thread:$0]  (%p1238_p5), %s1346_s9, 128, %s1344_s7, %s540_s8  }
 0x3c0 PF: > { %s565_s11 = sand.u32 1, %s1045_s15   ;;  %p1410_p12 = scmp.ne.s32.totalorder %s1397_s22, 0 }
 0x3c1   : > { %p1411_p2 = scmp.ge.s32.totalorder %s1057_s18, 2  ;;  %s566_s21 = scalar_lea.sflag [#allocation4], %s565_s11 }
 0x3c3   : > { %p810_p1 = pnand %p1411_p2, %p1410_p12 }
 0x3c5   : > { %1040 = dma.done.wait (!%p810_p1), %s566_s21, 128  }
 0x3c6   : > { %1042 = vsyncadd (!%p810_p1), %s566_s21, 4294967168  ;;  %p19_p4 = scmp.ge.s32.totalorder %s1206_s20, 4   ;;  %s1412_s15 = smov %s1049_s16 }
 0x3c7   : > { %s1413_s16 = smov %s1053_s17  ;;  %s1414_s17 = smov %s1234_s26 }
 0x3c8   : > { %s1415_s18 = smov %s1206_s20  ;;  %21 = sbr.rel (!%p19_p4) target bundleno = 7 (0x7), region = 93 }
 0x3cf   :  { %571 = vsyncpa [#allocation3], 1 }
 0x3d0   :  { %573 = vsyncpa [#allocation3 + $0x1], 1 }
 0x3d1   :  { %574 = vsyncpa [#allocation6], 1 }
 0x3d2   :  { %575 = vsyncpa [#allocation9], 1 }
 0x3d3   :  { %576 = vsyncpa [#allocation4], 1 }
 0x3d4   :  { %578 = vsyncpa [#allocation4 + $0x1], 1 }

</bundles_post_ra>
